<compile_context>
chip_gen: v6e
topology: v6e:2x2x1
jax: 0.10.0
libtpu: 0.0.40
codegen_flags: <defaults>
</compile_context>

<pallas_src>
import functools
import math

import jax
import jax.numpy as jnp
from jax.experimental import pallas as pl
from jax.experimental.pallas import tpu as pltpu

_BN_EPS = 1e-5
_VMEM_LIMIT = 32 * 1024 * 1024  # safe on v5e/v6e (128 MiB) and v7x (64 MiB)


def _round_up(x, m):
    return (x + m - 1) // m * m


# ---------------- pass 1: matmul + bias + per-feature sum / sumsq -----------
def _matmul_stats_kernel(x_ref, w_ref, b_ref, y_ref, stats_ref, *,
                         tile_m, m_valid, need_mask):
    # x_ref: (tile_m, Cp) bf16/f32   w_ref: (Cp, Fp) bf16/f32   b_ref: (1, Fp) f32
    # y_ref: (tile_m, Fp) f32        stats_ref: (8, Fp) f32 (row0=sum, row1=sumsq)
    y = jnp.dot(x_ref[...], w_ref[...], preferred_element_type=jnp.float32)
    y = y + b_ref[...]
    y_ref[...] = y

    if need_mask:
        # Padded rows (beyond the real M=B*N rows) must not pollute BN stats.
        row = (pl.program_id(0) * tile_m
               + jax.lax.broadcasted_iota(jnp.int32, (tile_m, 1), 0))
        ym = jnp.where(row < m_valid, y, 0.0)
    else:
        ym = y
    s = jnp.sum(ym, axis=0, keepdims=True)        # (1, Fp)
    ss = jnp.sum(ym * ym, axis=0, keepdims=True)  # (1, Fp)
    pad = jnp.zeros((6, s.shape[1]), jnp.float32)
    stats_ref[...] = jnp.concatenate([s, ss, pad], axis=0)


# ---------------- pass 2: folded BN (scale/shift) + ReLU ---------------------
def _bn_relu_kernel(y_ref, scale_ref, shift_ref, o_ref):
    o_ref[...] = jnp.maximum(
        y_ref[...] * scale_ref[...] + shift_ref[...], 0.0).astype(o_ref.dtype)


def linear_block(x, fc_weight, fc_bias, bn_gamma, bn_beta, *,
                 tile_m_rows=512, matmul_dtype=jnp.bfloat16):
    """x: (B, N, Cin) float32, fc_weight: (F, Cin) (PyTorch layout)."""
    B, N, Cin = x.shape
    F = fc_weight.shape[0]
    M = B * N
    f32 = jnp.float32

    # Lane-dense padding: MXU K dim and output feature dim -> multiples of 128.
    Cp = _round_up(Cin, 128)
    Fp = _round_up(F, 128)

    # Row tiling: single tile for small M (avoid per-step overhead), else
    # tile_m_rows rows per grid step with double-buffered pipelining.
    if M <= tile_m_rows:
        tile_m = _round_up(M, 8)
    else:
        tile_m = _round_up(tile_m_rows, 8)
    Mp = _round_up(M, tile_m)
    grid_m = Mp // tile_m
    need_mask = Mp != M

    # ---- host-side layout prep (pure layout / tiny tensors) ----
    x2d = jnp.pad(x.reshape(M, Cin).astype(f32), ((0, Mp - M), (0, Cp - Cin)))
    w = jnp.pad(fc_weight.T.astype(f32), ((0, Cp - Cin), (0, Fp - F)))
    if matmul_dtype is not None:
        x2d = x2d.astype(matmul_dtype)   # bf16 MXU inputs, f32 accumulation
        w = w.astype(matmul_dtype)
    b = jnp.pad(fc_bias.astype(f32), (0, Fp - F)).reshape(1, Fp)
    g = jnp.pad(bn_gamma.astype(f32), (0, Fp - F), constant_values=1.0)
    be = jnp.pad(bn_beta.astype(f32), (0, Fp - F))

    # ---------------- pass 1 ----------------
    kern1 = functools.partial(_matmul_stats_kernel, tile_m=tile_m,
                              m_valid=M, need_mask=need_mask)
    cost1 = pl.CostEstimate(
        flops=2 * Mp * Cp * Fp + 4 * Mp * Fp,
        transcendentals=0,
        bytes_accessed=int(x2d.size * x2d.dtype.itemsize
                           + w.size * w.dtype.itemsize
                           + b.size * 4 + Mp * Fp * 4 + grid_m * 8 * Fp * 4))
    y_pad, stats = pl.pallas_call(
        kern1,
        out_shape=(jax.ShapeDtypeStruct((Mp, Fp), f32),
                   jax.ShapeDtypeStruct((grid_m * 8, Fp), f32)),
        grid=(grid_m,),
        in_specs=[
            pl.BlockSpec((tile_m, Cp), lambda i: (i, 0)),
            pl.BlockSpec((Cp, Fp), lambda i: (0, 0)),
            pl.BlockSpec((1, Fp), lambda i: (0, 0)),
        ],
        out_specs=(pl.BlockSpec((tile_m, Fp), lambda i: (i, 0)),
                   pl.BlockSpec((8, Fp), lambda i: (i, 0))),
        compiler_params=pltpu.CompilerParams(
            dimension_semantics=("parallel",),
            vmem_limit_bytes=_VMEM_LIMIT),
        cost_estimate=cost1,
    )(x2d, w, b)

    # ---- fold BN into per-feature scale/shift (tiny (Fp,) work, plain JAX) --
    stats = stats.reshape(grid_m, 8, Fp)
    s = jnp.sum(stats[:, 0, :], axis=0)
    ss = jnp.sum(stats[:, 1, :], axis=0)
    mean = s / M
    var = jnp.maximum(ss / M - mean * mean, 0.0)  # biased (training-mode) var
    inv = jax.lax.rsqrt(var + _BN_EPS)
    scale = (g * inv).reshape(1, Fp)
    shift = (be - mean * g * inv).reshape(1, Fp)

    # ---------------- pass 2 ----------------
    cost2 = pl.CostEstimate(
        flops=3 * Mp * Fp, transcendentals=0,
        bytes_accessed=int(2 * Mp * Fp * 4 + 2 * Fp * 4))
    out_pad = pl.pallas_call(
        _bn_relu_kernel,
        out_shape=jax.ShapeDtypeStruct((Mp, Fp), x.dtype),
        grid=(grid_m,),
        in_specs=[
            pl.BlockSpec((tile_m, Fp), lambda i: (i, 0)),
            pl.BlockSpec((1, Fp), lambda i: (0, 0)),
            pl.BlockSpec((1, Fp), lambda i: (0, 0)),
        ],
        out_specs=pl.BlockSpec((tile_m, Fp), lambda i: (i, 0)),
        compiler_params=pltpu.CompilerParams(
            dimension_semantics=("parallel",),
            vmem_limit_bytes=_VMEM_LIMIT),
        cost_estimate=cost2,
    )(y_pad, scale, shift)

    return out_pad[:M, :F].reshape(B, N, F)


def _reference(x, fc_weight, fc_bias, bn_gamma, bn_beta, matmul_dtype=None):
    """Pure-JAX reference mirroring the PyTorch forward (training-mode BN).

    If matmul_dtype is given, the linear inputs are cast the same way the
    kernel casts them (bf16 MXU inputs with f32 accumulation)."""
    xm, wm = x, fc_weight
    if matmul_dtype is not None:
        xm = xm.astype(matmul_dtype)
        wm = wm.astype(matmul_dtype)
    y = jnp.einsum("bnc,fc->bnf", xm, wm,
                   preferred_element_type=jnp.float32) + fc_bias
    yt = jnp.transpose(y, (0, 2, 1))                       # (B, F, N)
    mean = jnp.mean(yt, axis=(0, 2), keepdims=True)
    var = jnp.mean((yt - mean) ** 2, axis=(0, 2), keepdims=True)
    ynorm = (yt - mean) * jax.lax.rsqrt(var + _BN_EPS)
    ynorm = ynorm * bn_gamma[None, :, None] + bn_beta[None, :, None]
    out = jnp.maximum(ynorm, 0.0)
    return jnp.transpose(out, (0, 2, 1))                   # (B, N, F)


if __name__ == "__main__":
    # Small shapes implied by the module: x is (B, N, in_features).
    B, N = 2, 8
    in_features = 32
    out_features = 32  # out_features = out_features or in_features

    key = jax.random.PRNGKey(0)
    kx, kw, kb = jax.random.split(key, 3)

    x = jax.random.normal(kx, (B, N, in_features), dtype=jnp.float32)
    # fc.weight ~ N(0, sqrt(2 / out_features))  (as in __init__)
    fc_weight = (
        jax.random.normal(kw, (out_features, in_features), dtype=jnp.float32)
        * math.sqrt(2.0 / out_features)
    )
    # fc.bias: default nn.Linear init U(-1/sqrt(in), 1/sqrt(in))
    bound = 1.0 / math.sqrt(in_features)
    fc_bias = jax.random.uniform(
        kb, (out_features,), minval=-bound, maxval=bound, dtype=jnp.float32
    )
    # bn.weight = 1, bn.bias = 0 (as in __init__)
    bn_gamma = jnp.ones((out_features,), dtype=jnp.float32)
    bn_beta = jnp.zeros((out_features,), dtype=jnp.float32)

    out = linear_block(x, fc_weight, fc_bias, bn_gamma, bn_beta)
    out = jax.block_until_ready(out)
    assert out.shape == (B, N, out_features)

    # Exact-numerics reference (models bf16 MXU inputs, f32 accumulation).
    ref_bf16 = _reference(x, fc_weight, fc_bias, bn_gamma, bn_beta,
                          matmul_dtype=jnp.bfloat16)
    assert jnp.allclose(out, ref_bf16, atol=1e-4, rtol=1e-4), "mismatch (bf16 ref)"

    # Parity with the original f32 module semantics (bf16 rounding only).
    ref_f32 = _reference(x, fc_weight, fc_bias, bn_gamma, bn_beta)
    assert jnp.allclose(out, ref_f32, atol=5e-2, rtol=5e-2), "mismatch (f32 ref)"

    # Exercise the multi-tile path (several M-tiles + masked BN statistics).
    B2, N2 = 4, 300
    x2 = jax.random.normal(jax.random.PRNGKey(1), (B2, N2, in_features),
                           dtype=jnp.float32)
    out2 = linear_block(x2, fc_weight, fc_bias, bn_gamma, bn_beta,
                        tile_m_rows=256)
    out2 = jax.block_until_ready(out2)
    ref2 = _reference(x2, fc_weight, fc_bias, bn_gamma, bn_beta,
                      matmul_dtype=jnp.bfloat16)
    assert out2.shape == (B2, N2, out_features)
    assert jnp.allclose(out2, ref2, atol=1e-4, rtol=1e-4), "mismatch (tiled)"

    print("KERNEL_OK")
</pallas_src>

<mosaic_0001>
module attributes {stable_mosaic.version = 11 : i64} {
  func.func @_matmul_stats_kernel(%arg0: i32, %arg1: memref<16x128xbf16, #tpu.memory_space<vmem>>, %arg2: memref<128x128xbf16, #tpu.memory_space<vmem>>, %arg3: memref<1x128xf32, #tpu.memory_space<vmem>>, %arg4: memref<16x128xf32, #tpu.memory_space<vmem>>, %arg5: memref<8x128xf32, #tpu.memory_space<vmem>>) attributes {dimension_semantics = [#tpu.dimension_semantics<parallel>], iteration_bounds = array<i64: 1>, scalar_prefetch = 0 : i64, scratch_operands = 0 : i64, tpu.core_type = #tpu.core_type<tc>, window_params = [{transform_indices = @transform_0, window_bounds = array<i64: 16, 128>}, {pipeline_mode = #tpu.pipeline_mode<synchronous>, transform_indices = @transform_1, window_bounds = array<i64: 128, 128>}, {pipeline_mode = #tpu.pipeline_mode<synchronous>, transform_indices = @transform_2, window_bounds = array<i64: 1, 128>}, {transform_indices = @transform_3, window_bounds = array<i64: 16, 128>}, {transform_indices = @transform_4, window_bounds = array<i64: 8, 128>}]} {
    %c0 = arith.constant 0 : index
    %c0_0 = arith.constant 0 : index
    %0 = vector.load %arg1[%c0, %c0_0] : memref<16x128xbf16, #tpu.memory_space<vmem>>, vector<16x128xbf16>
    %c0_1 = arith.constant 0 : index
    %c0_2 = arith.constant 0 : index
    %1 = vector.load %arg2[%c0_1, %c0_2] : memref<128x128xbf16, #tpu.memory_space<vmem>>, vector<128x128xbf16>
    %cst = arith.constant dense<0.000000e+00> : vector<16x128xf32>
    %2 = tpu.matmul %0, %1, %cst {dimension_numbers = #tpu.dot_dimension_numbers<[1], [0], [0], [1], [0, 0, 1, 1], [], []>} : vector<16x128xbf16>, vector<128x128xbf16>, vector<16x128xf32> -> vector<16x128xf32>
    %c0_3 = arith.constant 0 : index
    %c0_4 = arith.constant 0 : index
    %3 = vector.load %arg3[%c0_3, %c0_4] : memref<1x128xf32, #tpu.memory_space<vmem>>, vector<1x128xf32>
    %4 = vector.broadcast %3 : vector<1x128xf32> to vector<16x128xf32>
    %5 = arith.addf %2, %4 : vector<16x128xf32>
    %c0_5 = arith.constant 0 : index
    %c0_6 = arith.constant 0 : index
    %6 = vector.load %arg4[%c0_5, %c0_6] : memref<16x128xf32, #tpu.memory_space<vmem>>, vector<16x128xf32>
    tpu.vector_store %arg4[%c0_5, %c0_6], %5 {strides = array<i32>} : memref<16x128xf32, #tpu.memory_space<vmem>>, vector<16x128xf32>,
    %cst_7 = arith.constant dense<0.000000e+00> : vector<128xf32>
    %7 = vector.multi_reduction <add>, %5, %cst_7 [0] : vector<16x128xf32> to vector<128xf32>
    %8 = vector.shape_cast %7 : vector<128xf32> to vector<1x128xf32>
    %9 = arith.mulf %5, %5 : vector<16x128xf32>
    %cst_8 = arith.constant dense<0.000000e+00> : vector<128xf32>
    %10 = vector.multi_reduction <add>, %9, %cst_8 [0] : vector<16x128xf32> to vector<128xf32>
    %11 = vector.shape_cast %10 : vector<128xf32> to vector<1x128xf32>
    %cst_9 = arith.constant 0.000000e+00 : f32
    %12 = vector.broadcast %cst_9 : f32 to vector<6x128xf32>
    %13 = tpu.concatenate %8, %11, %12 in 0 : vector<1x128xf32>, vector<1x128xf32>, vector<6x128xf32> -> vector<8x128xf32>
    %c0_10 = arith.constant 0 : index
    %c0_11 = arith.constant 0 : index
    %14 = vector.load %arg5[%c0_10, %c0_11] : memref<8x128xf32, #tpu.memory_space<vmem>>, vector<8x128xf32>
    tpu.vector_store %arg5[%c0_10, %c0_11], %13 {strides = array<i32>} : memref<8x128xf32, #tpu.memory_space<vmem>>, vector<8x128xf32>,
    return
  }
  func.func @transform_0(%arg0: i32) -> (i32, i32) {
    %c0_i32 = arith.constant 0 : i32
    %c0_i32_0 = arith.constant 0 : i32
    return %arg0, %c0_i32 : i32, i32
  }
  func.func @transform_1(%arg0: i32) -> (i32, i32) {
    %c0_i32 = arith.constant 0 : i32
    %c0_i32_0 = arith.constant 0 : i32
    %c0_i32_1 = arith.constant 0 : i32
    return %c0_i32, %c0_i32_0 : i32, i32
  }
  func.func @transform_2(%arg0: i32) -> (i32, i32) {
    %c0_i32 = arith.constant 0 : i32
    %c0_i32_0 = arith.constant 0 : i32
    %c0_i32_1 = arith.constant 0 : i32
    return %c0_i32, %c0_i32_0 : i32, i32
  }
  func.func @transform_3(%arg0: i32) -> (i32, i32) {
    %c0_i32 = arith.constant 0 : i32
    %c0_i32_0 = arith.constant 0 : i32
    return %arg0, %c0_i32 : i32, i32
  }
  func.func @transform_4(%arg0: i32) -> (i32, i32) {
    %c0_i32 = arith.constant 0 : i32
    %c0_i32_0 = arith.constant 0 : i32
    return %arg0, %c0_i32 : i32, i32
  }
}

</mosaic_0001>

<bundles_post_ra>
// kernel: tpu_custom_call.1
= control target key start
LH: loop header
LB: loop body
LE: loop exit
PB: predicated region body
PF: predicated region fallthrough
CT: control target
= control target key end

     0   :  { %10 = vsyncpa [#allocation3], 0  ;;  %s418_s0 = inlined_call_operand.hbm [shape: bf16[16,128], index: 0, kind: input, shape index: {}]   ;;  %s419_s1 = inlined_call_operand.hbm [shape: bf16[128,128], index: 1, kind: input, shape index: {}]   ;;  %s420_s2 = inlined_call_operand.vmem [shape: f32[1,128], index: 2, kind: input, shape index: {}]   ;;  %s421_s3 = inlined_call_operand.hbm [shape: f32[16,128], index: 3, kind: output, shape index: {0}]   ;;  %s422_s4 = inlined_call_operand.hbm [shape: f32[8,128], index: 4, kind: output, shape index: {1}]  }
   0x1   :  { %11 = vsyncpa [#allocation6], 0 }
   0x2   :  { %12 = vsyncpa [#allocation4], 0 }
   0x3   :  { %13 = vsyncpa [#allocation9], 0  ;;  %s368_s15 = smov [#allocation2]  }
   0x4   :  { %s19_s16 = sshll.u32 %s368_s15, 4  ;;  %s20_s16 = int_to_ptr.vmem [resolvable:$true] %s19_s16 }
   0x5   :  { %s288_s17 = scalar_lea.vmem %s20_s16, 128  ;;  %p293_p1 = scmp.lt.s32.totalorder %s20_s16, %s20_s16 }
   0x6   :  { %p289_p0 = scmp.ne.s32.totalorder %s20_s16, %s288_s17  ;;  %p294_p2 = scmp.lt.s32.totalorder %s288_s17, %s288_s17 }
   0x8   :  { %p295_p3 = por %p294_p2, %p293_p1 }
   0xa   :  { %p296_p4 = pnand %p295_p3, %p289_p0 }
   0xc   :  { %299 = shalt.err (!%p296_p4)
}
   0xd   :  { %s369_s18 = smov 64   ;;  %s370_s19 = smov 4  }
   0xe   :  { %25 = dma.hbm_to_vmem [thread:$0]  %s418_s0, 128, %s20_s16, [#allocation3], %s369_s18, %s369_s18, %s370_s19  }
   0xf   :  { %s371_s22 = smov [#allocation5]  }
  0x10   :  { %s31_s23 = sshll.u32 %s371_s22, 4  ;;  %s32_s23 = int_to_ptr.vmem [resolvable:$true] %s31_s23 }
  0x11   :  { %s308_s24 = scalar_lea.vmem %s32_s23, 1024  ;;  %p313_p6 = scmp.lt.s32.totalorder %s32_s23, %s32_s23 }
  0x12   :  { %p309_p5 = scmp.ne.s32.totalorder %s32_s23, %s308_s24  ;;  %p314_p7 = scmp.lt.s32.totalorder %s308_s24, %s308_s24 }
  0x14   :  { %p315_p8 = por %p314_p7, %p313_p6 }
  0x16   :  { %p316_p9 = pnand %p315_p8, %p309_p5 }
  0x18   :  { %319 = shalt.err (!%p316_p9)
}
  0x19   :  { %37 = dma.hbm_to_vmem [thread:$0]  %s419_s1, 1024, %s32_s23, [#allocation6], %s369_s18, %s369_s18, %s370_s19  }
  0x1a   :  { %360 = dma.done.wait [#allocation3], 128  }
  0x1b   :  { %361 = vsyncadd [#allocation3], 4294967168 }
  0x1c   :  { %362 = dma.done.wait [#allocation6], 1024  }
  0x1d   :  { %363 = vsyncadd [#allocation6], 4294966272  ;;  %v372_v0 = vmov 0.0   ;;  %vm373_vm0 = vmmov 0   ;;  %v271_v1 = vld [vmem:[#allocation5 + $0x38] sm:$0xff]   ;;  %v272_v2 = vld [vmem:[#allocation5 + $0x30] sm:$0xff]  }
  0x1e   :  { %241 = vmatprep.subr.bf16.mxu0 %v372_v0  ;;  %257 = vmatprep.mubr.msk.bf16.mxu0 %vm373_vm0, %v372_v0  ;;  %v273_v3 = vld [vmem:[#allocation5 + $0x28] sm:$0xff]   ;;  %v274_v4 = vld [vmem:[#allocation5 + $0x20] sm:$0xff]   ;;  %v275_v5 = vld [vmem:[#allocation5 + $0x18] sm:$0xff]   ;;  %s374_s27 = smov [#allocation7]  }
  0x1f   :  { %242 = vmatpush3.bf16.msra.mxu0 %v271_v1  ;;  %v276_v6 = vld [vmem:[#allocation5 + $0x10] sm:$0xff]   ;;  %v277_v7 = vld [vmem:[#allocation5 + $0x8] sm:$0xff]   ;;  %v278_v8 = vld [vmem:[#allocation5] sm:$0xff]   ;;  %s195_s28 = sshll.u32 %s374_s27, 4  ;;  %s196_s28 = int_to_ptr.vmem [resolvable:$true] %s195_s28 }
  0x20   :  { %243 = vmatprep.subr.bf16.mxu0 %v372_v0  ;;  %v279_v9 = vld [vmem:[#allocation2] sm:$0xff]   ;;  %s320_s29 = scalar_lea.vmem %s196_s28, 256  ;;  %p325_p11 = scmp.lt.s32.totalorder %s196_s28, %s196_s28 }
  0x21   :  { %v222_v10 = vld [vmem:[%s420_s2] ss:$0 sm:$0xff]  ;;  %p321_p10 = scmp.ne.s32.totalorder %s196_s28, %s320_s29  ;;  %p326_p12 = scmp.lt.s32.totalorder %s320_s29, %s320_s29 }
  0x23   :  { %244 = vmatpush3.bf16.msra.mxu0 %v272_v2  ;;  %p327_p13 = por %p326_p12, %p325_p11 }
  0x24   :  { %245 = vmatprep.subr.bf16.mxu0 %v372_v0 }
  0x25   :  { %p328_p0 = pnand %p327_p13, %p321_p10 }
  0x27   :  { %246 = vmatpush3.bf16.msra.mxu0 %v273_v3 }
  0x28   :  { %247 = vmatprep.subr.bf16.mxu0 %v372_v0 }
  0x2b   :  { %248 = vmatpush3.bf16.msra.mxu0 %v274_v4 }
  0x2c   :  { %249 = vmatprep.subr.bf16.mxu0 %v372_v0 }
  0x2f   :  { %250 = vmatpush3.bf16.msra.mxu0 %v275_v5 }
  0x30   :  { %251 = vmatprep.subr.bf16.mxu0 %v372_v0 }
  0x33   :  { %252 = vmatpush3.bf16.msra.mxu0 %v276_v6 }
  0x34   :  { %253 = vmatprep.subr.bf16.mxu0 %v372_v0 }
  0x37   :  { %254 = vmatpush3.bf16.msra.mxu0 %v277_v7 }
  0x38   :  { %255 = vmatprep.subr.bf16.mxu0 %v372_v0 }
  0x3b   :  { %256 = vmatpush3.bf16.msra.mxu0 %v278_v8 }
  0x3e   :  { %258 = vmatmul.mubr.bf16.vlgmr.msra.gmra.mxu0 %v279_v9 }
  0xfe   :  { %v160_v11 = vpop.f32.mrf.mxu0 }
  0xff   :  { %v161_v12 = vadd.f32 %v222_v10, %v160_v11 }
 0x100   :  { %v259_v13 = vpop.f32.mrf.mxu0 }
 0x101   :  { %167 = vst [vmem:[#allocation7] sm:$0xff] %v161_v12  ;;  %v176_v17 = vmul.f32 %v161_v12, %v161_v12 }
 0x102   :  { %v163_v14 = vpop.f32.mrf.mxu0 }
 0x103   :  { %v164_v15 = vadd.f32 %v222_v10, %v163_v14 }
 0x104   :  { %v260_v16 = vpop.f32.mrf.mxu0 }
 0x105   :  { %168 = vst [vmem:[#allocation7 + $0x8] sm:$0xff] %v164_v15  ;;  %v169_v18 = vadd.f32 %v164_v15, %v161_v12  ;;  %v177_v19 = vmul.f32 %v164_v15, %v164_v15 }
 0x106   :  { %331 = shalt.err (!%p328_p0)
}
 0x107   :  { %s375_s2 = smov 128   ;;  %s376_s30 = smov 8   ;;  %v170_v20 = vrot.slane %v169_v18, 4  ;;  %v178_v21 = vadd.f32 %v177_v19, %v176_v17  ;;  %vm185_vm1 = vcmask 1040384   ;;  %vm187_vm2 = vcmask 1041408  }
 0x108   :  { %201 = dma.vmem_to_hbm [thread:$0]  %s196_s28, 256, %s421_s3, [#allocation4], %s375_s2, %s375_s2, %s376_s30  }
 0x109   :  { %v171_v22 = vadd.f32 %v170_v20, %v169_v18  ;;  %v179_v23 = vrot.slane %v178_v21, 4  ;;  %s377_s7 = smov [#allocation8]  }
 0x10a   :  { %s208_s8 = sshll.u32 %s377_s7, 4  ;;  %s209_s8 = int_to_ptr.vmem [resolvable:$true] %s208_s8 }
 0x10b   :  { %v172_v24 = vrot.slane %v171_v22, 2  ;;  %v180_v25 = vadd.f32 %v179_v23, %v178_v21  ;;  %s340_s3 = scalar_lea.vmem %s209_s8, 128  ;;  %p345_p2 = scmp.lt.s32.totalorder %s209_s8, %s209_s8 }
 0x10c   :  { %p341_p1 = scmp.ne.s32.totalorder %s209_s8, %s340_s3  ;;  %p346_p3 = scmp.lt.s32.totalorder %s340_s3, %s340_s3 }
 0x10d   :  { %v173_v26 = vadd.f32 %v172_v24, %v171_v22  ;;  %v181_v27 = vrot.slane %v180_v25, 2 }
 0x10e   :  { %p347_p4 = por %p346_p3, %p345_p2 }
 0x10f   :  { %v174_v28 = vrot.slane %v173_v26, 1  ;;  %v182_v29 = vadd.f32 %v181_v27, %v180_v25 }
 0x110   :  { %p348_p5 = pnand %p347_p4, %p341_p1 }
 0x111   :  { %v183_v30 = vrot.slane %v182_v29, 1  ;;  %v175_v31 = vadd.f32 %v174_v28, %v173_v26 }
 0x113   :  { %v184_v32 = vadd.f32 %v183_v30, %v182_v29 }
 0x115   :  { %v186_v33 = vsel %vm185_vm1, %v175_v31, %v184_v32 }
 0x116   :  { %v188_v34 = vsel %vm187_vm2, %v186_v33, 0.0 }
 0x117   :  { %189 = vst [vmem:[#allocation8] sm:$0xff] %v188_v34 }
 0x118   :  { %351 = shalt.err (!%p348_p5)
}
 0x119   :  { %211 = dma.vmem_to_hbm [thread:$0]  %s209_s8, 128, %s422_s4, [#allocation9]  }
 0x11a   :  { %364 = dma.done.wait [#allocation4], 256  }
 0x11b   :  { %365 = vsyncadd [#allocation4], 4294967040 }
 0x11c   :  { %366 = dma.done.wait [#allocation9], 128  }
 0x11d   :  { %367 = vsyncadd [#allocation9], 4294967168 }
 0x11e   :  { %218 = vsyncpa [#allocation3], 1 }
 0x11f   :  { %219 = vsyncpa [#allocation6], 1 }
 0x120   :  { %220 = vsyncpa [#allocation4], 1 }
 0x121   :  { %221 = vsyncpa [#allocation9], 1 }

</bundles_post_ra>
